<compile_context>
chip_gen: v7x
topology: tpu7x:2x2x1
jax: 0.10.0
libtpu: 0.0.40
codegen_flags: <defaults>
</compile_context>

<pallas_src>
import functools

import jax
import jax.numpy as jnp
from jax.experimental import pallas as pl
from jax.experimental.pallas import tpu as pltpu

LN_EPS = 1e-5       # PyTorch nn.LayerNorm default
_TB_MAX = 256       # batch tile rows (multiple of 8 sublanes; fits all gens)


def _round_up(x, m):
    return ((x + m - 1) // m) * m


def _layernorm(h, gamma, beta):
    mean = jnp.mean(h, axis=-1, keepdims=True)
    centered = h - mean
    var = jnp.mean(centered * centered, axis=-1, keepdims=True)
    inv = jax.lax.rsqrt(var + LN_EPS)
    return centered * inv * gamma + beta


def actor_kernel(x_ref, w1_ref, w2_ref, wmu_ref, vec_ref, out_ref):
    """One batch tile: (TB, in) -> (TB, n_pad)."""
    x = x_ref[...].astype(jnp.float32)
    fc1 = w1_ref.shape[1]
    fc2 = w2_ref.shape[1]
    n_pad = wmu_ref.shape[1]

    # Packed per-layer vectors: rows [b1, g1, be1, b2, g2, be2, bmu, pad].
    vecs = vec_ref[...]
    b1, g1, be1 = vecs[0:1, :fc1], vecs[1:2, :fc1], vecs[2:3, :fc1]
    b2, g2, be2 = vecs[3:4, :fc2], vecs[4:5, :fc2], vecs[5:6, :fc2]
    bmu = vecs[6:7, :n_pad]

    # fc1 -> LayerNorm -> ReLU
    h = jnp.dot(x, w1_ref[...], preferred_element_type=jnp.float32) + b1
    h = jnp.maximum(_layernorm(h, g1, be1), 0.0)

    # fc2 -> LayerNorm -> ReLU
    h = jnp.dot(h, w2_ref[...], preferred_element_type=jnp.float32) + b2
    h = jnp.maximum(_layernorm(h, g2, be2), 0.0)

    # mu -> tanh (lane-dense padded output; padded columns are tanh(0)=0)
    out = jnp.tanh(
        jnp.dot(h, wmu_ref[...], preferred_element_type=jnp.float32) + bmu)
    out_ref[...] = out.astype(out_ref.dtype)


@jax.jit
def actor_forward(state, params):
    (w1, b1, g1, be1, w2, b2, g2, be2, wmu, bmu) = params
    B, input_dim = state.shape
    fc1 = w1.shape[1]
    fc2 = w2.shape[1]
    n_actions = wmu.shape[1]

    # ---------------- static tiling decisions ----------------
    n_pad = _round_up(max(n_actions, 1), 128)            # lane-dense output
    d_max = _round_up(max(fc1, fc2, n_actions), 128)     # packed-vector width

    b_pad8 = _round_up(max(B, 1), 8)
    if b_pad8 <= _TB_MAX:
        tb = b_pad8
        b_pad = b_pad8
    else:
        tb = _TB_MAX
        b_pad = _round_up(B, tb)
    grid = (b_pad // tb,)

    # ---------------- tiny host-side packing (fused by XLA) ----------------
    state_p = jnp.pad(state.astype(jnp.float32), ((0, b_pad - B), (0, 0)))
    wmu_p = jnp.pad(wmu.astype(jnp.float32), ((0, 0), (0, n_pad - n_actions)))

    def _row(v):
        v = v.reshape(1, -1).astype(jnp.float32)
        return jnp.pad(v, ((0, 0), (0, d_max - v.shape[1])))

    vecs = jnp.concatenate(
        [_row(b1), _row(g1), _row(be1),
         _row(b2), _row(g2), _row(be2),
         _row(bmu), jnp.zeros((1, d_max), jnp.float32)],
        axis=0)                                            # (8, d_max)

    # ---------------- cost estimate for XLA scheduling ----------------
    flops = 2 * b_pad * (input_dim * fc1 + fc1 * fc2 + fc2 * n_pad)
    transcendentals = b_pad * (2 + n_pad)                 # 2 rsqrt + tanh row
    bytes_accessed = 4 * (b_pad * input_dim + input_dim * fc1 + fc1 * fc2
                          + fc2 * n_pad + 8 * d_max + b_pad * n_pad)

    inv = lambda i: (0, 0)  # grid-invariant blocks (weights / packed vectors)

    out_p = pl.pallas_call(
        actor_kernel,
        out_shape=jax.ShapeDtypeStruct((b_pad, n_pad), jnp.float32),
        grid=grid,
        in_specs=[
            pl.BlockSpec((tb, input_dim), lambda i: (i, 0)),   # state tile
            pl.BlockSpec((input_dim, fc1), inv),               # w1
            pl.BlockSpec((fc1, fc2), inv),                     # w2
            pl.BlockSpec((fc2, n_pad), inv),                   # wmu (padded)
            pl.BlockSpec((8, d_max), inv),                     # packed vectors
        ],
        out_specs=pl.BlockSpec((tb, n_pad), lambda i: (i, 0)),
        compiler_params=pltpu.CompilerParams(
            dimension_semantics=("parallel",),       # megacore batch sharding
            vmem_limit_bytes=32 * 1024 * 1024),      # safe on v5e/v6e/v7x
        cost_estimate=pl.CostEstimate(
            flops=flops,
            transcendentals=transcendentals,
            bytes_accessed=bytes_accessed),
    )(state_p, w1.astype(jnp.float32), w2.astype(jnp.float32), wmu_p, vecs)

    return out_p[:B, :n_actions]


def actor_reference(state, params):
    """Pure-JAX reference matching the PyTorch forward."""
    (w1, b1, g1, be1, w2, b2, g2, be2, wmu, bmu) = params

    def ln(h, g, b):
        m = jnp.mean(h, axis=-1, keepdims=True)
        v = jnp.mean((h - m) ** 2, axis=-1, keepdims=True)
        return (h - m) * jax.lax.rsqrt(v + LN_EPS) * g + b

    h = jnp.maximum(ln(state @ w1 + b1, g1, be1), 0.0)
    h = jnp.maximum(ln(h @ w2 + b2, g2, be2), 0.0)
    return jnp.tanh(h @ wmu + bmu)


def init_actor_params(key, input_dim, fc1_dims, fc2_dims, n_actions):
    """Deterministic init mirroring the PyTorch __init__ ranges.

    fc1/fc2 weights & biases ~ U(-f, f) with f = 1/sqrt(weight.size(0))
    (as written in the reference code), mu weight & bias ~ U(-0.003, 0.003),
    LayerNorm gamma=1, beta=0.  Weights stored as (in, out) = PyTorch
    weight transposed so the kernel computes x @ W + b.
    """
    k1, k2, k3, k4, k5, k6 = jax.random.split(key, 6)
    f1 = 1.0 / jnp.sqrt(fc1_dims)
    f2 = 1.0 / jnp.sqrt(fc2_dims)
    f3 = 0.003

    w1 = jax.random.uniform(k1, (input_dim, fc1_dims), jnp.float32, -f1, f1)
    b1 = jax.random.uniform(k2, (1, fc1_dims), jnp.float32, -f1, f1)
    g1 = jnp.ones((1, fc1_dims), jnp.float32)
    be1 = jnp.zeros((1, fc1_dims), jnp.float32)

    w2 = jax.random.uniform(k3, (fc1_dims, fc2_dims), jnp.float32, -f2, f2)
    b2 = jax.random.uniform(k4, (1, fc2_dims), jnp.float32, -f2, f2)
    g2 = jnp.ones((1, fc2_dims), jnp.float32)
    be2 = jnp.zeros((1, fc2_dims), jnp.float32)

    wmu = jax.random.uniform(k5, (fc2_dims, n_actions), jnp.float32, -f3, f3)
    bmu = jax.random.uniform(k6, (1, n_actions), jnp.float32, -f3, f3)

    return (w1, b1, g1, be1, w2, b2, g2, be2, wmu, bmu)


if __name__ == "__main__":
    # Small, forward-consistent shapes: batch=2, input_dims=(8,), fc1=32,
    # fc2=32, n_actions=4.
    B, INPUT_DIM, FC1, FC2, N_ACTIONS = 2, 8, 32, 32, 4

    key = jax.random.PRNGKey(0)
    kp, kx = jax.random.split(key)
    params = init_actor_params(kp, INPUT_DIM, FC1, FC2, N_ACTIONS)
    state = jax.random.normal(kx, (B, INPUT_DIM), jnp.float32)

    out = actor_forward(state, params)
    jax.block_until_ready(out)

    ref = actor_reference(state, params)
    assert out.shape == (B, N_ACTIONS)
    assert bool(jnp.all(jnp.abs(out) <= 1.0))          # tanh range sanity
    assert bool(jnp.allclose(out, ref, atol=1e-5, rtol=1e-5))
    print("KERNEL_OK")
</pallas_src>

<mosaic_0001>
module attributes {stable_mosaic.version = 11 : i64} {
  func.func @actor_kernel(%arg0: i32, %arg1: memref<8x8xf32, #tpu.memory_space<vmem>>, %arg2: memref<8x32xf32, #tpu.memory_space<vmem>>, %arg3: memref<32x32xf32, #tpu.memory_space<vmem>>, %arg4: memref<32x128xf32, #tpu.memory_space<vmem>>, %arg5: memref<8x128xf32, #tpu.memory_space<vmem>>, %arg6: memref<8x128xf32, #tpu.memory_space<vmem>>) attributes {dimension_semantics = [#tpu.dimension_semantics<parallel>], iteration_bounds = array<i64: 1>, scalar_prefetch = 0 : i64, scratch_operands = 0 : i64, tpu.core_type = #tpu.core_type<tc>, window_params = [{transform_indices = @transform_0, window_bounds = array<i64: 8, 8>}, {pipeline_mode = #tpu.pipeline_mode<synchronous>, transform_indices = @transform_1, window_bounds = array<i64: 8, 32>}, {pipeline_mode = #tpu.pipeline_mode<synchronous>, transform_indices = @transform_2, window_bounds = array<i64: 32, 32>}, {pipeline_mode = #tpu.pipeline_mode<synchronous>, transform_indices = @transform_3, window_bounds = array<i64: 32, 128>}, {pipeline_mode = #tpu.pipeline_mode<synchronous>, transform_indices = @transform_4, window_bounds = array<i64: 8, 128>}, {transform_indices = @transform_5, window_bounds = array<i64: 8, 128>}]} {
    %c0 = arith.constant 0 : index
    %c0_0 = arith.constant 0 : index
    %0 = vector.load %arg1[%c0, %c0_0] : memref<8x8xf32, #tpu.memory_space<vmem>>, vector<8x8xf32>
    %c0_1 = arith.constant 0 : index
    %c0_2 = arith.constant 0 : index
    %1 = vector.load %arg5[%c0_1, %c0_2] : memref<8x128xf32, #tpu.memory_space<vmem>>, vector<8x128xf32>
    %2 = vector.extract_strided_slice %1 {offsets = [0, 0], sizes = [1, 32], strides = [1, 1]} : vector<8x128xf32> to vector<1x32xf32>
    %3 = vector.extract_strided_slice %1 {offsets = [1, 0], sizes = [1, 32], strides = [1, 1]} : vector<8x128xf32> to vector<1x32xf32>
    %4 = vector.extract_strided_slice %1 {offsets = [2, 0], sizes = [1, 32], strides = [1, 1]} : vector<8x128xf32> to vector<1x32xf32>
    %5 = vector.extract_strided_slice %1 {offsets = [3, 0], sizes = [1, 32], strides = [1, 1]} : vector<8x128xf32> to vector<1x32xf32>
    %6 = vector.extract_strided_slice %1 {offsets = [4, 0], sizes = [1, 32], strides = [1, 1]} : vector<8x128xf32> to vector<1x32xf32>
    %7 = vector.extract_strided_slice %1 {offsets = [5, 0], sizes = [1, 32], strides = [1, 1]} : vector<8x128xf32> to vector<1x32xf32>
    %8 = vector.extract_strided_slice %1 {offsets = [6, 0], sizes = [1, 128], strides = [1, 1]} : vector<8x128xf32> to vector<1x128xf32>
    %c0_3 = arith.constant 0 : index
    %c0_4 = arith.constant 0 : index
    %9 = vector.load %arg2[%c0_3, %c0_4] : memref<8x32xf32, #tpu.memory_space<vmem>>, vector<8x32xf32>
    %cst = arith.constant dense<0.000000e+00> : vector<8x32xf32>
    %10 = tpu.matmul %0, %9, %cst {dimension_numbers = #tpu.dot_dimension_numbers<[1], [0], [0], [1], [0, 0, 1, 1], [], []>} : vector<8x8xf32>, vector<8x32xf32>, vector<8x32xf32> -> vector<8x32xf32>
    %11 = vector.broadcast %2 : vector<1x32xf32> to vector<8x32xf32>
    %12 = arith.addf %10, %11 : vector<8x32xf32>
    %cst_5 = arith.constant dense<0.000000e+00> : vector<8xf32>
    %13 = vector.multi_reduction <add>, %12, %cst_5 [1] : vector<8x32xf32> to vector<8xf32>
    %14 = vector.shape_cast %13 : vector<8xf32> to vector<8x1xf32>
    %cst_6 = arith.constant 3.200000e+01 : f32
    %15 = vector.broadcast %cst_6 : f32 to vector<8x1xf32>
    %16 = arith.divf %14, %15 : vector<8x1xf32>
    %17 = vector.broadcast %16 : vector<8x1xf32> to vector<8x32xf32>
    %18 = arith.subf %12, %17 : vector<8x32xf32>
    %19 = arith.mulf %18, %18 : vector<8x32xf32>
    %cst_7 = arith.constant dense<0.000000e+00> : vector<8xf32>
    %20 = vector.multi_reduction <add>, %19, %cst_7 [1] : vector<8x32xf32> to vector<8xf32>
    %21 = vector.shape_cast %20 : vector<8xf32> to vector<8x1xf32>
    %cst_8 = arith.constant 3.200000e+01 : f32
    %22 = vector.broadcast %cst_8 : f32 to vector<8x1xf32>
    %23 = arith.divf %21, %22 : vector<8x1xf32>
    %cst_9 = arith.constant 9.99999974E-6 : f32
    %24 = vector.broadcast %cst_9 : f32 to vector<8x1xf32>
    %25 = arith.addf %23, %24 : vector<8x1xf32>
    %26 = math.rsqrt %25 : vector<8x1xf32>
    %27 = vector.broadcast %26 : vector<8x1xf32> to vector<8x32xf32>
    %28 = arith.mulf %18, %27 : vector<8x32xf32>
    %29 = vector.broadcast %3 : vector<1x32xf32> to vector<8x32xf32>
    %30 = arith.mulf %28, %29 : vector<8x32xf32>
    %31 = vector.broadcast %4 : vector<1x32xf32> to vector<8x32xf32>
    %32 = arith.addf %30, %31 : vector<8x32xf32>
    %cst_10 = arith.constant 0.000000e+00 : f32
    %33 = vector.broadcast %cst_10 : f32 to vector<8x32xf32>
    %34 = arith.maximumf %32, %33 : vector<8x32xf32>
    %c0_11 = arith.constant 0 : index
    %c0_12 = arith.constant 0 : index
    %35 = vector.load %arg3[%c0_11, %c0_12] : memref<32x32xf32, #tpu.memory_space<vmem>>, vector<32x32xf32>
    %cst_13 = arith.constant dense<0.000000e+00> : vector<8x32xf32>
    %36 = tpu.matmul %34, %35, %cst_13 {dimension_numbers = #tpu.dot_dimension_numbers<[1], [0], [0], [1], [0, 0, 1, 1], [], []>} : vector<8x32xf32>, vector<32x32xf32>, vector<8x32xf32> -> vector<8x32xf32>
    %37 = vector.broadcast %5 : vector<1x32xf32> to vector<8x32xf32>
    %38 = arith.addf %36, %37 : vector<8x32xf32>
    %cst_14 = arith.constant dense<0.000000e+00> : vector<8xf32>
    %39 = vector.multi_reduction <add>, %38, %cst_14 [1] : vector<8x32xf32> to vector<8xf32>
    %40 = vector.shape_cast %39 : vector<8xf32> to vector<8x1xf32>
    %cst_15 = arith.constant 3.200000e+01 : f32
    %41 = vector.broadcast %cst_15 : f32 to vector<8x1xf32>
    %42 = arith.divf %40, %41 : vector<8x1xf32>
    %43 = vector.broadcast %42 : vector<8x1xf32> to vector<8x32xf32>
    %44 = arith.subf %38, %43 : vector<8x32xf32>
    %45 = arith.mulf %44, %44 : vector<8x32xf32>
    %cst_16 = arith.constant dense<0.000000e+00> : vector<8xf32>
    %46 = vector.multi_reduction <add>, %45, %cst_16 [1] : vector<8x32xf32> to vector<8xf32>
    %47 = vector.shape_cast %46 : vector<8xf32> to vector<8x1xf32>
    %cst_17 = arith.constant 3.200000e+01 : f32
    %48 = vector.broadcast %cst_17 : f32 to vector<8x1xf32>
    %49 = arith.divf %47, %48 : vector<8x1xf32>
    %cst_18 = arith.constant 9.99999974E-6 : f32
    %50 = vector.broadcast %cst_18 : f32 to vector<8x1xf32>
    %51 = arith.addf %49, %50 : vector<8x1xf32>
    %52 = math.rsqrt %51 : vector<8x1xf32>
    %53 = vector.broadcast %52 : vector<8x1xf32> to vector<8x32xf32>
    %54 = arith.mulf %44, %53 : vector<8x32xf32>
    %55 = vector.broadcast %6 : vector<1x32xf32> to vector<8x32xf32>
    %56 = arith.mulf %54, %55 : vector<8x32xf32>
    %57 = vector.broadcast %7 : vector<1x32xf32> to vector<8x32xf32>
    %58 = arith.addf %56, %57 : vector<8x32xf32>
    %cst_19 = arith.constant 0.000000e+00 : f32
    %59 = vector.broadcast %cst_19 : f32 to vector<8x32xf32>
    %60 = arith.maximumf %58, %59 : vector<8x32xf32>
    %c0_20 = arith.constant 0 : index
    %c0_21 = arith.constant 0 : index
    %61 = vector.load %arg4[%c0_20, %c0_21] : memref<32x128xf32, #tpu.memory_space<vmem>>, vector<32x128xf32>
    %cst_22 = arith.constant dense<0.000000e+00> : vector<8x128xf32>
    %62 = tpu.matmul %60, %61, %cst_22 {dimension_numbers = #tpu.dot_dimension_numbers<[1], [0], [0], [1], [0, 0, 1, 1], [], []>} : vector<8x32xf32>, vector<32x128xf32>, vector<8x128xf32> -> vector<8x128xf32>
    %63 = vector.broadcast %8 : vector<1x128xf32> to vector<8x128xf32>
    %64 = arith.addf %62, %63 : vector<8x128xf32>
    %65 = math.tanh %64 : vector<8x128xf32>
    %c0_23 = arith.constant 0 : index
    %c0_24 = arith.constant 0 : index
    %66 = vector.load %arg6[%c0_23, %c0_24] : memref<8x128xf32, #tpu.memory_space<vmem>>, vector<8x128xf32>
    tpu.vector_store %arg6[%c0_23, %c0_24], %65 {strides = array<i32>} : memref<8x128xf32, #tpu.memory_space<vmem>>, vector<8x128xf32>,
    return
  }
  func.func @transform_0(%arg0: i32) -> (i32, i32) {
    %c0_i32 = arith.constant 0 : i32
    %c0_i32_0 = arith.constant 0 : i32
    return %arg0, %c0_i32 : i32, i32
  }
  func.func @transform_1(%arg0: i32) -> (i32, i32) {
    %c0_i32 = arith.constant 0 : i32
    %c0_i32_0 = arith.constant 0 : i32
    %c0_i32_1 = arith.constant 0 : i32
    return %c0_i32, %c0_i32_0 : i32, i32
  }
  func.func @transform_2(%arg0: i32) -> (i32, i32) {
    %c0_i32 = arith.constant 0 : i32
    %c0_i32_0 = arith.constant 0 : i32
    %c0_i32_1 = arith.constant 0 : i32
    return %c0_i32, %c0_i32_0 : i32, i32
  }
  func.func @transform_3(%arg0: i32) -> (i32, i32) {
    %c0_i32 = arith.constant 0 : i32
    %c0_i32_0 = arith.constant 0 : i32
    %c0_i32_1 = arith.constant 0 : i32
    return %c0_i32, %c0_i32_0 : i32, i32
  }
  func.func @transform_4(%arg0: i32) -> (i32, i32) {
    %c0_i32 = arith.constant 0 : i32
    %c0_i32_0 = arith.constant 0 : i32
    %c0_i32_1 = arith.constant 0 : i32
    return %c0_i32, %c0_i32_0 : i32, i32
  }
  func.func @transform_5(%arg0: i32) -> (i32, i32) {
    %c0_i32 = arith.constant 0 : i32
    %c0_i32_0 = arith.constant 0 : i32
    return %arg0, %c0_i32 : i32, i32
  }
}

</mosaic_0001>

<bundles_post_ra>
// kernel: actor_forward.1
= control target key start
LH: loop header
LB: loop body
LE: loop exit
PB: predicated region body
PF: predicated region fallthrough
CT: control target
= control target key end

     0   :  { %vm27_vm0 = vcmask 64512   ;;  %v382_v0 = vmov 0.0   ;;  %vm383_vm1 = vmmov 0   ;;  %v23_v3 = vlaneseq  ;;  %s475_s1 = inlined_call_operand.vmem [shape: f32[8,32], index: 1, kind: input, shape index: {}]   ;;  %s476_s0 = inlined_call_operand.vmem [shape: f32[8,8], index: 0, kind: input, shape index: {}]   ;;  %s477_s4 = inlined_call_operand.vmem [shape: f32[8,128], index: 4, kind: input, shape index: {}]   ;;  %s478_s2 = inlined_call_operand.vmem [shape: f32[32,32], index: 2, kind: input, shape index: {}]   ;;  %s479_s3 = inlined_call_operand.vmem [shape: f32[32,128], index: 3, kind: input, shape index: {}]   ;;  %s480_s5 = inlined_call_operand.vmem [shape: f32[8,128], index: 5, kind: output, shape index: {}]  }
   0x1   :  { %334 = vmatprep.subr.mxu0 %v382_v0  ;;  %v22_v1 = vld [vmem:[%s475_s1] sm:$0xff]  ;;  %336 = vmatprep.mubr.msk.f32.mxu0 %vm383_vm1, %v382_v0  ;;  %vm101_vm2 = vcmask 261120   ;;  %v128_v18 = vld [vmem:[%s478_s2 + $0x8] sm:$0xff]  ;;  %v384_v20 = vmov 0.0|0.0   ;;  %v129_v21 = vld [vmem:[%s478_s2 + $0x10] sm:$0xff] }
   0x2   :  { %v20_v2 = vld [vmem:[%s476_s0] sm:$0xff]  ;;  %335 = vmatpush3.msra.mxu0 %v22_v1  ;;  %347 = vmatprep.mubr.msk.f32.mxu1 %vm383_vm1, %v382_v0  ;;  %v421_v4 = vshrl.u32 %v23_v3, 7  ;;  %v130_v22 = vld [vmem:[%s478_s2 + $0x18] sm:$0xff]  ;;  %v233_v48 = vld [vmem:[%s479_s3 + $0x8] sm:$0xff] }
   0x3   :  { %337 = vmatmul.mubr.msk.f32.vlgmr.msra.gmra.mrb[0].mxu0 %vm27_vm0, %v20_v2  ;;  %v427_v6 = vld [vmem:[%s477_s4] sm:$0xff]  ;;  %361 = vmatprep.subr.bf16.mxu1 %v384_v20  ;;  %v365_v23 = vpack.c.bf16 %v130_v22, %v129_v21  ;;  %v234_v50 = vld [vmem:[%s479_s3 + $0x10] sm:$0xff]  ;;  %v235_v51 = vld [vmem:[%s479_s3 + $0x18] sm:$0xff] }
   0x4   :  { %358 = vmatprep.mubr.msk.f32.mxu0 %vm383_vm1, %v382_v0  ;;  %v25_v5 = vsub.s32 0, %v421_v4  ;;  %v127_v17 = vld [vmem:[%s478_s2] sm:$0xff]  ;;  %367 = vmatprep.subr.bf16.mxu0 %v384_v20  ;;  %v118_v27 = vsub.s32 1, %v421_v4  ;;  %v123_v28 = vsub.s32 2, %v421_v4  ;;  %v133_v36 = vsub.s32 3, %v421_v4 }
   0x5   :  { %v362_v19 = vpack.c.bf16 %v128_v18, %v127_v17  ;;  %v232_v47 = vld [vmem:[%s479_s3] sm:$0xff]  ;;  %v371_v52 = vpack.c.bf16 %v235_v51, %v234_v50  ;;  %v223_v56 = vsub.s32 4, %v421_v4  ;;  %v228_v57 = vsub.s32 5, %v421_v4 }
   0x6   :  { %v26_v7 = vrot.slane %v427_v6, %v25_v5  ;;  %v119_v29 = vrot.slane %v427_v6, %v118_v27  ;;  %v124_v32 = vrot.slane %v427_v6, %v123_v28  ;;  %v134_v37 = vrot.slane %v427_v6, %v133_v36 }
   0x7   :  { %363 = vmatpush3.bf16.msra.mxu1 %v362_v19  ;;  %v368_v49 = vpack.c.bf16 %v233_v48, %v232_v47  ;;  %v224_v58 = vrot.slane %v427_v6, %v223_v56  ;;  %v229_v61 = vrot.slane %v427_v6, %v228_v57  ;;  %v238_v1 = vsub.s32 6, %v421_v4 }
   0x8   :  { %364 = vmatprep.subr.bf16.mxu1 %v384_v20 }
   0x9   :  { %369 = vmatpush3.bf16.msra.mxu0 %v368_v49  ;;  %v239_v2 = vrot.slane %v427_v6, %v238_v1 }
   0xa   :  { %370 = vmatprep.subr.bf16.mxu0 %v384_v20 }
   0xb   :  { %366 = vmatpush3.bf16.msra.mxu1 %v365_v23 }
   0xd   :  { %372 = vmatpush3.bf16.msra.mxu0 %v371_v52 }
  0xd6   :  { %v97_v8 = vpop.f32.mrb[0].mxu0 }
  0xd7   :  { %v98_v9 = vadd.f32 %v97_v8, %v26_v7  ;;  %v338_v10 = vpop.f32.mrb[1].mxu0 }
  0xd9   :  { %v102_v11 = vsel %vm101_vm2, %v98_v9, 0.0 }
  0xda   :  { %103 = vadd.xlane.f32.xlu0 %v102_v11 }
 0x167   :  { %v104_v12 = vpop.xlane.xlu0 %103 }
 0x168   :  { %v106_v13 = vmul.f32 0.03125, %v104_v12 }
 0x16a   :  { %v107_v14 = vsub.f32 %v98_v9, %v106_v13 }
 0x16c   :  { %v108_v15 = vmul.f32 %v107_v14, %v107_v14 }
 0x16e   :  { %v109_v16 = vsel %vm101_vm2, %v108_v15, 0.0 }
 0x16f   :  { %110 = vadd.xlane.f32.xlu0 %v109_v16 }
 0x1fc   :  { %v111_v24 = vpop.xlane.xlu0 %110 }
 0x1fd   :  { %v112_v25 = vmul.f32 0.03125, %v111_v24 }
 0x1ff   :  { %v113_v26 = vadd.f32 1e-05, %v112_v25 }
 0x201   :  { %376 = vrsqrt.f32 %v113_v26 }
 0x20b   :  { %v377_v30 = vpop.eup %376 }
 0x20c   :  { %v115_v31 = vmul.f32 %v377_v30, %v107_v14 }
 0x20e   :  { %v120_v33 = vmul.f32 %v119_v29, %v115_v31 }
 0x210   :  { %v125_v34 = vadd.f32 %v124_v32, %v120_v33 }
 0x212   :  { %v126_v35 = vmax.f32 %v125_v34, 0.0 }
 0x214   :  { %348 = vmatmul.mubr.msk.f32.vlgmr.msra.gmra.mrb[0].mxu1 %vm101_vm2, %v126_v35 }
 0x2e7   :  { %v204_v38 = vpop.f32.mrb[0].mxu1 }
 0x2e8   :  { %v205_v39 = vadd.f32 %v204_v38, %v134_v37  ;;  %v349_v40 = vpop.f32.mrb[1].mxu1 }
 0x2ea   :  { %v208_v41 = vsel %vm101_vm2, %v205_v39, 0.0 }
 0x2eb   :  { %209 = vadd.xlane.f32.xlu1 %v208_v41 }
 0x378   :  { %v210_v42 = vpop.xlane.xlu1 %209 }
 0x379   :  { %v211_v43 = vmul.f32 0.03125, %v210_v42 }
 0x37b   :  { %v212_v44 = vsub.f32 %v205_v39, %v211_v43 }
 0x37d   :  { %v213_v45 = vmul.f32 %v212_v44, %v212_v44 }
 0x37f   :  { %v214_v46 = vsel %vm101_vm2, %v213_v45, 0.0 }
 0x380   :  { %215 = vadd.xlane.f32.xlu1 %v214_v46 }
 0x40d   :  { %v216_v53 = vpop.xlane.xlu1 %215 }
 0x40e   :  { %v217_v54 = vmul.f32 0.03125, %v216_v53 }
 0x410   :  { %v218_v55 = vadd.f32 1e-05, %v217_v54 }
 0x412   :  { %378 = vrsqrt.f32 %v218_v55 }
 0x41c   :  { %v379_v59 = vpop.eup %378 }
 0x41d   :  { %v220_v60 = vmul.f32 %v379_v59, %v212_v44 }
 0x41f   :  { %v225_v62 = vmul.f32 %v224_v58, %v220_v60 }
 0x421   :  { %v230_v63 = vadd.f32 %v229_v61, %v225_v62 }
 0x423   :  { %v231_v0 = vmax.f32 %v230_v63, 0.0 }
 0x425   :  { %359 = vmatmul.mubr.msk.f32.vlgmr.msra.gmra.mrb[2].mxu0 %vm101_vm2, %v231_v0 }
 0x4f8   :  { %v309_v3 = vpop.f32.mrb[2].mxu0 }
 0x4f9   :  { %v310_v5 = vadd.f32 %v309_v3, %v239_v2  ;;  %v360_v7 = vpop.f32.mrb[3].mxu0 }
 0x4fb   :  { %380 = vtanh.f32 %v310_v5 }
 0x505   :  { %v381_v8 = vpop.eup %380 }
 0x506   :  { %314 = vst [vmem:[%s480_s5] sm:$0xff] %v381_v8 }

</bundles_post_ra>
